<compile_context>
chip_gen: v5e
topology: v5e:2x2
jax: 0.10.0
libtpu: 0.0.40
codegen_flags: <defaults>
</compile_context>

<pallas_src>
import jax
import jax.numpy as jnp
from jax import lax
from jax.experimental import pallas as pl
from jax.experimental.pallas import tpu as pltpu


def _round_up(n, m):
    return ((n + m - 1) // m) * m


def _const_spec(shape):
    """BlockSpec for a grid-invariant operand: single-buffered when supported."""
    index_map = lambda i: (0,) * len(shape)
    try:
        return pl.BlockSpec(shape, index_map, pipeline_mode=pl.Buffered(1))
    except (TypeError, AttributeError):
        # TODO(synk): jax version without BlockSpec pipeline_mode -> default double-buffering.
        return pl.BlockSpec(shape, index_map)


def _make_adapter_kernel(d_real, mm_dtype):
    inv_d = 1.0 / float(d_real)
    eps = 1e-5

    def kernel(x_ref, w1_ref, b1_ref, w2_ref, b2_ref, gamma_ref, beta_ref, o_ref):
        # x_ref: (tm, Dp)   w1_ref: (Dp, Ap)   w2_ref: (Ap, Dp)
        x = x_ref[...].astype(jnp.float32)
        # ---- LayerNorm (pre-norm), single fused pass over the lane axis ----
        # Padded feature columns are zero, so sums over Dp equal sums over real D.
        mean = jnp.sum(x, axis=-1, keepdims=True) * inv_d
        mean_sq = jnp.sum(x * x, axis=-1, keepdims=True) * inv_d
        var = jnp.maximum(mean_sq - mean * mean, 0.0)
        xn = (x - mean) * lax.rsqrt(var + eps)
        xn = xn * gamma_ref[...] + beta_ref[...]   # padded gamma/beta = 0 -> padded cols stay 0
        # ---- fc1 + ReLU (bf16 operands, f32 accumulation) ----
        h = jnp.dot(xn.astype(mm_dtype), w1_ref[...],
                    preferred_element_type=jnp.float32) + b1_ref[...]
        h = jnp.maximum(h, 0.0)
        # TODO(synk): activation_dropout / dropout are identity in eval mode (no RNG here).
        # ---- fc2 ----
        y = jnp.dot(h.astype(mm_dtype), w2_ref[...],
                    preferred_element_type=jnp.float32) + b2_ref[...]
        # ---- residual add: re-read the resident VMEM tile (keeps live ranges short) ----
        o_ref[...] = (y + x_ref[...].astype(jnp.float32)).astype(o_ref.dtype)

    return kernel


def adapter_layer(x, w1, b1, w2, b2, gamma, beta, *, tm=256,
                  matmul_dtype=jnp.bfloat16):
    """x: (T, B, D). w1: (D, A), w2: (A, D) (already transposed from torch (out, in))."""
    T, B, D = x.shape
    A = w1.shape[1]
    n_tok = T * B

    # Lane-dense padding of the feature axes (multiples of 128).
    Dp = _round_up(D, 128)
    Ap = _round_up(A, 128)

    # Token tile: large for real workloads, clamped (to a multiple of 8) for tiny inputs.
    tm = max(8, min(tm, _round_up(n_tok, 8)))
    n_pad = _round_up(n_tok, tm)

    x2 = x.reshape(n_tok, D)
    x2 = jnp.pad(x2, ((0, n_pad - n_tok), (0, Dp - D)))

    f32 = jnp.float32
    w1p = jnp.pad(w1, ((0, Dp - D), (0, Ap - A))).astype(matmul_dtype)
    w2p = jnp.pad(w2, ((0, Ap - A), (0, Dp - D))).astype(matmul_dtype)
    b1p = jnp.pad(b1, (0, Ap - A)).reshape(1, Ap).astype(f32)
    b2p = jnp.pad(b2, (0, Dp - D)).reshape(1, Dp).astype(f32)
    gp = jnp.pad(gamma, (0, Dp - D)).reshape(1, Dp).astype(f32)
    bp = jnp.pad(beta, (0, Dp - D)).reshape(1, Dp).astype(f32)

    grid = (n_pad // tm,)

    # VMEM budget: 2x-buffered x-in and out tiles, single-buffered constants,
    # plus headroom for the f32 xn/h temporaries.
    itemsize = jnp.dtype(x2.dtype).itemsize
    tile_bytes = tm * Dp * itemsize
    const_bytes = (2 * Dp * Ap) * jnp.dtype(matmul_dtype).itemsize + (3 * Dp + Ap) * 4
    scratch_bytes = 2 * tm * max(Dp, Ap) * 4
    vmem_need = 4 * tile_bytes + const_bytes + scratch_bytes
    vmem_limit = int(min(max(2 * vmem_need, 16 * 1024 * 1024), 96 * 1024 * 1024))

    out = pl.pallas_call(
        _make_adapter_kernel(D, matmul_dtype),
        out_shape=jax.ShapeDtypeStruct((n_pad, Dp), x.dtype),
        grid_spec=pltpu.PrefetchScalarGridSpec(
            num_scalar_prefetch=0,
            grid=grid,
            in_specs=[
                pl.BlockSpec((tm, Dp), lambda i: (i, 0)),   # x tile (double-buffered)
                _const_spec((Dp, Ap)),                      # W1
                _const_spec((1, Ap)),                       # b1
                _const_spec((Ap, Dp)),                      # W2
                _const_spec((1, Dp)),                       # b2
                _const_spec((1, Dp)),                       # gamma
                _const_spec((1, Dp)),                       # beta
            ],
            out_specs=pl.BlockSpec((tm, Dp), lambda i: (i, 0)),
        ),
        compiler_params=pltpu.CompilerParams(
            dimension_semantics=("parallel",),
            vmem_limit_bytes=vmem_limit,
        ),
    )(x2, w1p, b1p, w2p, b2p, gp, bp)

    return out[:n_tok, :D].reshape(T, B, D)


def adapter_layer_ref(x, w1, b1, w2, b2, gamma, beta):
    """Pure-JAX reference mirroring the PyTorch forward (eval mode, pre-norm)."""
    residual = x
    mean = jnp.mean(x, axis=-1, keepdims=True)
    var = jnp.mean((x - mean) ** 2, axis=-1, keepdims=True)
    xn = (x - mean) * lax.rsqrt(var + 1e-5) * gamma + beta
    h = jax.nn.relu(xn @ w1 + b1)
    y = h @ w2 + b2
    return y + residual


if __name__ == "__main__":
    # Small shapes consistent with the module: seq=8, batch=2,
    # encoder_embed_dim=32, adapter_dim=16.
    T, B, D, A = 8, 2, 32, 16

    key = jax.random.PRNGKey(0)
    kx, k1, k2, k3, k4 = jax.random.split(key, 5)

    x = jax.random.normal(kx, (T, B, D), dtype=jnp.float32)

    # nn.Linear-style deterministic init (uniform in +-1/sqrt(fan_in)),
    # stored already transposed to (in, out) for the kernel.
    lim1 = 1.0 / (D ** 0.5)
    w1 = jax.random.uniform(k1, (D, A), minval=-lim1, maxval=lim1, dtype=jnp.float32)
    b1 = jax.random.uniform(k2, (A,), minval=-lim1, maxval=lim1, dtype=jnp.float32)
    lim2 = 1.0 / (A ** 0.5)
    w2 = jax.random.uniform(k3, (A, D), minval=-lim2, maxval=lim2, dtype=jnp.float32)
    b2 = jax.random.uniform(k4, (D,), minval=-lim2, maxval=lim2, dtype=jnp.float32)
    gamma = jnp.ones((D,), dtype=jnp.float32)
    beta = jnp.zeros((D,), dtype=jnp.float32)

    ref = adapter_layer_ref(x, w1, b1, w2, b2, gamma, beta)

    # f32-matmul path: tight semantics check (padding / LN / residual correctness).
    out_f32 = jax.block_until_ready(
        adapter_layer(x, w1, b1, w2, b2, gamma, beta, matmul_dtype=jnp.float32))
    assert out_f32.shape == (T, B, D)
    assert jnp.allclose(out_f32, ref, atol=1e-4, rtol=1e-4), "f32 kernel mismatch vs reference"

    # Default bf16-matmul path (f32 accumulation): looser tolerance.
    out_bf16 = jax.block_until_ready(adapter_layer(x, w1, b1, w2, b2, gamma, beta))
    assert out_bf16.shape == (T, B, D)
    assert jnp.allclose(out_bf16, ref, atol=2e-2, rtol=2e-2), "bf16 kernel mismatch vs reference"

    print("KERNEL_OK")
</pallas_src>

<mosaic_0001>
module attributes {stable_mosaic.version = 11 : i64} {
  func.func @kernel(%arg0: i32, %arg1: memref<16x128xf32, #tpu.memory_space<vmem>>, %arg2: memref<128x128xf32, #tpu.memory_space<vmem>>, %arg3: memref<1x128xf32, #tpu.memory_space<vmem>>, %arg4: memref<128x128xf32, #tpu.memory_space<vmem>>, %arg5: memref<1x128xf32, #tpu.memory_space<vmem>>, %arg6: memref<1x128xf32, #tpu.memory_space<vmem>>, %arg7: memref<1x128xf32, #tpu.memory_space<vmem>>, %arg8: memref<16x128xf32, #tpu.memory_space<vmem>>) attributes {dimension_semantics = [#tpu.dimension_semantics<parallel>], iteration_bounds = array<i64: 1>, scalar_prefetch = 0 : i64, scratch_operands = 0 : i64, tpu.core_type = #tpu.core_type<tc>, window_params = [{transform_indices = @transform_0, window_bounds = array<i64: 16, 128>}, {pipeline_mode = #tpu.pipeline_mode<synchronous>, transform_indices = @transform_1, window_bounds = array<i64: 128, 128>}, {pipeline_mode = #tpu.pipeline_mode<synchronous>, transform_indices = @transform_2, window_bounds = array<i64: 1, 128>}, {pipeline_mode = #tpu.pipeline_mode<synchronous>, transform_indices = @transform_3, window_bounds = array<i64: 128, 128>}, {pipeline_mode = #tpu.pipeline_mode<synchronous>, transform_indices = @transform_4, window_bounds = array<i64: 1, 128>}, {pipeline_mode = #tpu.pipeline_mode<synchronous>, transform_indices = @transform_5, window_bounds = array<i64: 1, 128>}, {pipeline_mode = #tpu.pipeline_mode<synchronous>, transform_indices = @transform_6, window_bounds = array<i64: 1, 128>}, {transform_indices = @transform_7, window_bounds = array<i64: 16, 128>}]} {
    %c0 = arith.constant 0 : index
    %c0_0 = arith.constant 0 : index
    %0 = vector.load %arg1[%c0, %c0_0] : memref<16x128xf32, #tpu.memory_space<vmem>>, vector<16x128xf32>
    %cst = arith.constant dense<0.000000e+00> : vector<16xf32>
    %1 = vector.multi_reduction <add>, %0, %cst [1] : vector<16x128xf32> to vector<16xf32>
    %2 = vector.shape_cast %1 : vector<16xf32> to vector<16x1xf32>
    %cst_1 = arith.constant 3.125000e-02 : f32
    %3 = vector.broadcast %cst_1 : f32 to vector<16x1xf32>
    %4 = arith.mulf %2, %3 : vector<16x1xf32>
    %5 = arith.mulf %0, %0 : vector<16x128xf32>
    %cst_2 = arith.constant dense<0.000000e+00> : vector<16xf32>
    %6 = vector.multi_reduction <add>, %5, %cst_2 [1] : vector<16x128xf32> to vector<16xf32>
    %7 = vector.shape_cast %6 : vector<16xf32> to vector<16x1xf32>
    %cst_3 = arith.constant 3.125000e-02 : f32
    %8 = vector.broadcast %cst_3 : f32 to vector<16x1xf32>
    %9 = arith.mulf %7, %8 : vector<16x1xf32>
    %10 = arith.mulf %4, %4 : vector<16x1xf32>
    %11 = arith.subf %9, %10 : vector<16x1xf32>
    %cst_4 = arith.constant 0.000000e+00 : f32
    %12 = vector.broadcast %cst_4 : f32 to vector<16x1xf32>
    %13 = arith.maximumf %11, %12 : vector<16x1xf32>
    %14 = vector.broadcast %4 : vector<16x1xf32> to vector<16x128xf32>
    %15 = arith.subf %0, %14 : vector<16x128xf32>
    %cst_5 = arith.constant 9.99999974E-6 : f32
    %16 = vector.broadcast %cst_5 : f32 to vector<16x1xf32>
    %17 = arith.addf %13, %16 : vector<16x1xf32>
    %18 = math.rsqrt %17 : vector<16x1xf32>
    %19 = vector.broadcast %18 : vector<16x1xf32> to vector<16x128xf32>
    %20 = arith.mulf %15, %19 : vector<16x128xf32>
    %c0_6 = arith.constant 0 : index
    %c0_7 = arith.constant 0 : index
    %21 = vector.load %arg6[%c0_6, %c0_7] : memref<1x128xf32, #tpu.memory_space<vmem>>, vector<1x128xf32>
    %22 = vector.broadcast %21 : vector<1x128xf32> to vector<16x128xf32>
    %23 = arith.mulf %20, %22 : vector<16x128xf32>
    %c0_8 = arith.constant 0 : index
    %c0_9 = arith.constant 0 : index
    %24 = vector.load %arg7[%c0_8, %c0_9] : memref<1x128xf32, #tpu.memory_space<vmem>>, vector<1x128xf32>
    %25 = vector.broadcast %24 : vector<1x128xf32> to vector<16x128xf32>
    %26 = arith.addf %23, %25 : vector<16x128xf32>
    %c0_10 = arith.constant 0 : index
    %c0_11 = arith.constant 0 : index
    %27 = vector.load %arg2[%c0_10, %c0_11] : memref<128x128xf32, #tpu.memory_space<vmem>>, vector<128x128xf32>
    %cst_12 = arith.constant dense<0.000000e+00> : vector<16x128xf32>
    %28 = tpu.matmul %26, %27, %cst_12 {dimension_numbers = #tpu.dot_dimension_numbers<[1], [0], [0], [1], [0, 0, 1, 1], [], []>} : vector<16x128xf32>, vector<128x128xf32>, vector<16x128xf32> -> vector<16x128xf32>
    %c0_13 = arith.constant 0 : index
    %c0_14 = arith.constant 0 : index
    %29 = vector.load %arg3[%c0_13, %c0_14] : memref<1x128xf32, #tpu.memory_space<vmem>>, vector<1x128xf32>
    %30 = vector.broadcast %29 : vector<1x128xf32> to vector<16x128xf32>
    %31 = arith.addf %28, %30 : vector<16x128xf32>
    %cst_15 = arith.constant 0.000000e+00 : f32
    %32 = vector.broadcast %cst_15 : f32 to vector<16x128xf32>
    %33 = arith.maximumf %31, %32 : vector<16x128xf32>
    %c0_16 = arith.constant 0 : index
    %c0_17 = arith.constant 0 : index
    %34 = vector.load %arg4[%c0_16, %c0_17] : memref<128x128xf32, #tpu.memory_space<vmem>>, vector<128x128xf32>
    %cst_18 = arith.constant dense<0.000000e+00> : vector<16x128xf32>
    %35 = tpu.matmul %33, %34, %cst_18 {dimension_numbers = #tpu.dot_dimension_numbers<[1], [0], [0], [1], [0, 0, 1, 1], [], []>} : vector<16x128xf32>, vector<128x128xf32>, vector<16x128xf32> -> vector<16x128xf32>
    %c0_19 = arith.constant 0 : index
    %c0_20 = arith.constant 0 : index
    %36 = vector.load %arg5[%c0_19, %c0_20] : memref<1x128xf32, #tpu.memory_space<vmem>>, vector<1x128xf32>
    %37 = vector.broadcast %36 : vector<1x128xf32> to vector<16x128xf32>
    %38 = arith.addf %35, %37 : vector<16x128xf32>
    %c0_21 = arith.constant 0 : index
    %c0_22 = arith.constant 0 : index
    %39 = vector.load %arg1[%c0_21, %c0_22] : memref<16x128xf32, #tpu.memory_space<vmem>>, vector<16x128xf32>
    %40 = arith.addf %38, %39 : vector<16x128xf32>
    %c0_23 = arith.constant 0 : index
    %c0_24 = arith.constant 0 : index
    %41 = vector.load %arg8[%c0_23, %c0_24] : memref<16x128xf32, #tpu.memory_space<vmem>>, vector<16x128xf32>
    tpu.vector_store %arg8[%c0_23, %c0_24], %40 {strides = array<i32>} : memref<16x128xf32, #tpu.memory_space<vmem>>, vector<16x128xf32>,
    return
  }
  func.func @transform_0(%arg0: i32) -> (i32, i32) {
    %c0_i32 = arith.constant 0 : i32
    %c0_i32_0 = arith.constant 0 : i32
    return %arg0, %c0_i32 : i32, i32
  }
  func.func @transform_1(%arg0: i32) -> (i32, i32) {
    %c0_i32 = arith.constant 0 : i32
    %c0_i32_0 = arith.constant 0 : i32
    %c0_i32_1 = arith.constant 0 : i32
    return %c0_i32, %c0_i32_0 : i32, i32
  }
  func.func @transform_2(%arg0: i32) -> (i32, i32) {
    %c0_i32 = arith.constant 0 : i32
    %c0_i32_0 = arith.constant 0 : i32
    %c0_i32_1 = arith.constant 0 : i32
    return %c0_i32, %c0_i32_0 : i32, i32
  }
  func.func @transform_3(%arg0: i32) -> (i32, i32) {
    %c0_i32 = arith.constant 0 : i32
    %c0_i32_0 = arith.constant 0 : i32
    %c0_i32_1 = arith.constant 0 : i32
    return %c0_i32, %c0_i32_0 : i32, i32
  }
  func.func @transform_4(%arg0: i32) -> (i32, i32) {
    %c0_i32 = arith.constant 0 : i32
    %c0_i32_0 = arith.constant 0 : i32
    %c0_i32_1 = arith.constant 0 : i32
    return %c0_i32, %c0_i32_0 : i32, i32
  }
  func.func @transform_5(%arg0: i32) -> (i32, i32) {
    %c0_i32 = arith.constant 0 : i32
    %c0_i32_0 = arith.constant 0 : i32
    %c0_i32_1 = arith.constant 0 : i32
    return %c0_i32, %c0_i32_0 : i32, i32
  }
  func.func @transform_6(%arg0: i32) -> (i32, i32) {
    %c0_i32 = arith.constant 0 : i32
    %c0_i32_0 = arith.constant 0 : i32
    %c0_i32_1 = arith.constant 0 : i32
    return %c0_i32, %c0_i32_0 : i32, i32
  }
  func.func @transform_7(%arg0: i32) -> (i32, i32) {
    %c0_i32 = arith.constant 0 : i32
    %c0_i32_0 = arith.constant 0 : i32
    return %arg0, %c0_i32 : i32, i32
  }
}

</mosaic_0001>

<bundles_post_ra>
// kernel: tpu_custom_call.1
= control target key start
LH: loop header
LB: loop body
LE: loop exit
PB: predicated region body
PF: predicated region fallthrough
CT: control target
= control target key end

     0   :  { %12 = vsyncpa [#allocation3], 0  ;;  %s500_s0 = inlined_call_operand.hbm [shape: f32[16,128], index: 0, kind: input, shape index: {}]   ;;  %s501_s1 = inlined_call_operand.hbm [shape: f32[128,128], index: 1, kind: input, shape index: {}]   ;;  %s502_s2 = inlined_call_operand.vmem [shape: f32[1,128], index: 2, kind: input, shape index: {}]   ;;  %s503_s3 = inlined_call_operand.hbm [shape: f32[128,128], index: 3, kind: input, shape index: {}]   ;;  %s504_s4 = inlined_call_operand.vmem [shape: f32[1,128], index: 4, kind: input, shape index: {}]   ;;  %s505_s5 = inlined_call_operand.vmem [shape: f32[1,128], index: 5, kind: input, shape index: {}]   ;;  %s506_s6 = inlined_call_operand.vmem [shape: f32[1,128], index: 6, kind: input, shape index: {}]   ;;  %s507_s7 = inlined_call_operand.hbm [shape: f32[16,128], index: 7, kind: output, shape index: {}]  }
   0x1   :  { %13 = vsyncpa [#allocation6], 0 }
   0x2   :  { %14 = vsyncpa [#allocation4], 0  ;;  %s32_s26 = sshll.u32 %s501_s1, 4  ;;  %s394_s27 = smov [#allocation5]   ;;  %s33_s26 = int_to_ptr.hbm [resolvable:$true] %s32_s26 }
   0x3   :  { %s34_s28 = sshll.u32 %s394_s27, 4  ;;  %s19_s8 = sshll.u32 %s500_s0, 4  ;;  %s35_s28 = int_to_ptr.vmem [resolvable:$true] %s34_s28  ;;  %s20_s8 = int_to_ptr.hbm [resolvable:$true] %s19_s8 }
   0x4   :  { %s395_s9 = smov 128   ;;  %s396_s10 = smov 8  }
   0x5   :  { %40 = dma.hbm_to_vmem [thread:$0]  %s33_s26, 2048, %s35_s28, [#allocation6], %s395_s9, %s395_s9, %s396_s10  }
   0x6   :  { %s397_s11 = smov [#allocation2]   ;;  %s47_s1 = sshll.u32 %s503_s3, 4  ;;  %s48_s1 = int_to_ptr.hbm [resolvable:$true] %s47_s1 }
   0x7   :  { %s21_s12 = sshll.u32 %s397_s11, 4  ;;  %s398_s0 = smov [#allocation7]   ;;  %s22_s12 = int_to_ptr.vmem [resolvable:$true] %s21_s12 }
   0x8   :  { %27 = dma.hbm_to_vmem [thread:$0]  %s20_s8, 256, %s22_s12, [#allocation3], %s395_s9, %s395_s9, %s396_s10  }
   0x9   :  { %s49_s15 = sshll.u32 %s398_s0, 4  ;;  %s50_s15 = int_to_ptr.vmem [resolvable:$true] %s49_s15 }
   0xa   :  { %55 = dma.hbm_to_vmem [thread:$0]  %s48_s1, 2048, %s50_s15, [#allocation6], %s395_s9, %s395_s9, %s396_s10  }
   0xb   :  { %388 = dma.done.wait [#allocation3], 256  }
   0xc   :  { %389 = vsyncadd [#allocation3], 4294967040 }
   0xd   :  { %390 = dma.done.wait [#allocation6], 4096  }
   0xe   :  { %391 = vsyncadd [#allocation6], 4294963200  ;;  %v458_v0 = vld [vmem:[#allocation2 + $0x8] sm:$0xff]  ;;  %v460_v1 = vld [vmem:[#allocation2] sm:$0xff]  ;;  %s399_s21 = smov [#allocation8]   ;;  %s232_s24 = sshll.u32 %s507_s7, 4  ;;  %s233_s24 = int_to_ptr.hbm [resolvable:$true] %s232_s24 }
   0xf   :  { %78 = vadd.xlane.f32.xlu0 %v458_v0  ;;  %76 = vadd.xlane.f32.xlu1 %v460_v1  ;;  %v83_v2 = vmul.f32 %v458_v0, %v458_v0  ;;  %v82_v3 = vmul.f32 %v460_v1, %v460_v1  ;;  %v149_v4 = vld [vmem:[#allocation5 + $0x78] sm:$0xff]  ;;  %v148_v5 = vld [vmem:[#allocation5 + $0x70] sm:$0xff]  ;;  %v147_v6 = vld [vmem:[#allocation5 + $0x68] sm:$0xff] }
  0x10   :  { %154 = vmatpush.msra.mxu0 %v149_v4  ;;  %246 = vmatpush.msra.mxu2 %v149_v4  ;;  %v146_v7 = vld [vmem:[#allocation5 + $0x60] sm:$0xff]  ;;  %v145_v8 = vld [vmem:[#allocation5 + $0x58] sm:$0xff]  ;;  %v144_v9 = vld [vmem:[#allocation5 + $0x50] sm:$0xff] }
  0x11   :  { %v143_v10 = vld [vmem:[#allocation5 + $0x48] sm:$0xff]  ;;  %v142_v11 = vld [vmem:[#allocation5 + $0x40] sm:$0xff]  ;;  %v141_v12 = vld [vmem:[#allocation5 + $0x38] sm:$0xff] }
  0x12   :  { %155 = vmatpush.msra.mxu0 %v148_v5  ;;  %247 = vmatpush.msra.mxu2 %v148_v5  ;;  %v140_v13 = vld [vmem:[#allocation5 + $0x30] sm:$0xff]  ;;  %v139_v14 = vld [vmem:[#allocation5 + $0x28] sm:$0xff]  ;;  %v138_v15 = vld [vmem:[#allocation5 + $0x20] sm:$0xff] }
  0x13   :  { %v137_v18 = vld [vmem:[#allocation5 + $0x18] sm:$0xff]  ;;  %v136_v19 = vld [vmem:[#allocation5 + $0x10] sm:$0xff]  ;;  %v135_v21 = vld [vmem:[#allocation5 + $0x8] sm:$0xff] }
  0x14   :  { %156 = vmatpush.msra.mxu0 %v147_v6  ;;  %248 = vmatpush.msra.mxu2 %v147_v6  ;;  %v134_v23 = vld [vmem:[#allocation5] sm:$0xff]  ;;  %v194_v30 = vld [vmem:[#allocation7 + $0x78] sm:$0xff]  ;;  %v193_v31 = vld [vmem:[#allocation7 + $0x70] sm:$0xff] }
  0x15   :  { %199 = vmatpush.msra.mxu1 %v194_v30  ;;  %262 = vmatpush.msra.mxu3 %v194_v30  ;;  %v192_v34 = vld [vmem:[#allocation7 + $0x68] sm:$0xff]  ;;  %v191_v37 = vld [vmem:[#allocation7 + $0x60] sm:$0xff]  ;;  %v190_v40 = vld [vmem:[#allocation7 + $0x58] sm:$0xff] }
  0x16   :  { %157 = vmatpush.msra.mxu0 %v146_v7  ;;  %249 = vmatpush.msra.mxu2 %v146_v7  ;;  %v189_v41 = vld [vmem:[#allocation7 + $0x50] sm:$0xff]  ;;  %v188_v42 = vld [vmem:[#allocation7 + $0x48] sm:$0xff]  ;;  %v187_v43 = vld [vmem:[#allocation7 + $0x40] sm:$0xff] }
  0x17   :  { %86 = vadd.xlane.f32.xlu0 %v83_v2  ;;  %84 = vadd.xlane.f32.xlu1 %v82_v3  ;;  %v186_v47 = vld [vmem:[#allocation7 + $0x38] sm:$0xff]  ;;  %v185_v50 = vld [vmem:[#allocation7 + $0x30] sm:$0xff]  ;;  %v184_v53 = vld [vmem:[#allocation7 + $0x28] sm:$0xff] }
  0x18   :  { %158 = vmatpush.msra.mxu0 %v145_v8  ;;  %250 = vmatpush.msra.mxu2 %v145_v8  ;;  %v183_v56 = vld [vmem:[#allocation7 + $0x20] sm:$0xff]  ;;  %v182_v59 = vld [vmem:[#allocation7 + $0x18] sm:$0xff]  ;;  %v284_v62 = vld [vmem:[%s505_s5] ss:$0 sm:$0xff] }
  0x19   :  { %200 = vmatpush.msra.mxu1 %v193_v31  ;;  %263 = vmatpush.msra.mxu3 %v193_v31  ;;  %v285_v4 = vld [vmem:[%s506_s6] ss:$0 sm:$0xff] }
  0x1a   :  { %159 = vmatpush.msra.mxu0 %v144_v9  ;;  %251 = vmatpush.msra.mxu2 %v144_v9 }
  0x1b   :  { %201 = vmatpush.msra.mxu1 %v192_v34  ;;  %264 = vmatpush.msra.mxu3 %v192_v34 }
  0x1c   :  { %160 = vmatpush.msra.mxu0 %v143_v10  ;;  %252 = vmatpush.msra.mxu2 %v143_v10 }
  0x1d   :  { %202 = vmatpush.msra.mxu1 %v191_v37  ;;  %265 = vmatpush.msra.mxu3 %v191_v37 }
  0x1e   :  { %161 = vmatpush.msra.mxu0 %v142_v11  ;;  %253 = vmatpush.msra.mxu2 %v142_v11  ;;  %v181_v11 = vld [vmem:[#allocation7 + $0x10] sm:$0xff] }
  0x1f   :  { %203 = vmatpush.msra.mxu1 %v190_v40  ;;  %266 = vmatpush.msra.mxu3 %v190_v40 }
  0x20   :  { %162 = vmatpush.msra.mxu0 %v141_v12  ;;  %254 = vmatpush.msra.mxu2 %v141_v12  ;;  %v180_v12 = vld [vmem:[#allocation7 + $0x8] sm:$0xff] }
  0x21   :  { %204 = vmatpush.msra.mxu1 %v189_v41  ;;  %267 = vmatpush.msra.mxu3 %v189_v41 }
  0x22   :  { %163 = vmatpush.msra.mxu0 %v140_v13  ;;  %255 = vmatpush.msra.mxu2 %v140_v13  ;;  %v179_v13 = vld [vmem:[#allocation7] sm:$0xff] }
  0x23   :  { %205 = vmatpush.msra.mxu1 %v188_v42  ;;  %268 = vmatpush.msra.mxu3 %v188_v42 }
  0x24   :  { %164 = vmatpush.msra.mxu0 %v139_v14  ;;  %256 = vmatpush.msra.mxu2 %v139_v14  ;;  %v286_v14 = vld [vmem:[%s502_s2] ss:$0 sm:$0xff]  ;;  %s230_s2 = sshll.u32 %s399_s21, 4  ;;  %s231_s2 = int_to_ptr.vmem [resolvable:$true] %s230_s2 }
  0x25   :  { %206 = vmatpush.msra.mxu1 %v187_v43  ;;  %269 = vmatpush.msra.mxu3 %v187_v43 }
  0x26   :  { %165 = vmatpush.msra.mxu0 %v138_v15  ;;  %257 = vmatpush.msra.mxu2 %v138_v15 }
  0x27   :  { %207 = vmatpush.msra.mxu1 %v186_v47  ;;  %270 = vmatpush.msra.mxu3 %v186_v47 }
  0x28   :  { %166 = vmatpush.msra.mxu0 %v137_v18  ;;  %258 = vmatpush.msra.mxu2 %v137_v18 }
  0x29   :  { %208 = vmatpush.msra.mxu1 %v185_v50  ;;  %271 = vmatpush.msra.mxu3 %v185_v50 }
  0x2a   :  { %167 = vmatpush.msra.mxu0 %v136_v19  ;;  %259 = vmatpush.msra.mxu2 %v136_v19 }
  0x2b   :  { %209 = vmatpush.msra.mxu1 %v184_v53  ;;  %272 = vmatpush.msra.mxu3 %v184_v53 }
  0x2c   :  { %168 = vmatpush.msra.mxu0 %v135_v21  ;;  %260 = vmatpush.msra.mxu2 %v135_v21  ;;  %v287_v21 = vld [vmem:[%s504_s4] ss:$0 sm:$0xff] }
  0x2d   :  { %210 = vmatpush.msra.mxu1 %v183_v56  ;;  %273 = vmatpush.msra.mxu3 %v183_v56 }
  0x2e   :  { %169 = vmatpush.msra.mxu0 %v134_v23  ;;  %261 = vmatpush.msra.mxu2 %v134_v23 }
  0x2f   :  { %211 = vmatpush.msra.mxu1 %v182_v59  ;;  %274 = vmatpush.msra.mxu3 %v182_v59 }
  0x31   :  { %212 = vmatpush.msra.mxu1 %v181_v11  ;;  %275 = vmatpush.msra.mxu3 %v181_v11 }
  0x33   :  { %213 = vmatpush.msra.mxu1 %v180_v12  ;;  %276 = vmatpush.msra.mxu3 %v180_v12 }
  0x35   :  { %214 = vmatpush.msra.mxu1 %v179_v13  ;;  %277 = vmatpush.msra.mxu3 %v179_v13 }
  0x82   :  { %v79_v16 = vpop.xlane.xlu0 %78  ;;  %v77_v17 = vpop.xlane.xlu1 %76 }
  0x83   :  { %v468_v20 = vmul.f32 0.03125, %v77_v17  ;;  %v470_v22 = vmul.f32 0.03125, %v79_v16 }
  0x85   :  { %v90_v24 = vmul.f32 %v468_v20, %v468_v20  ;;  %v91_v27 = vmul.f32 %v470_v22, %v470_v22  ;;  %v97_v60 = vsub.f32 %v458_v0, %v470_v22  ;;  %v96_v63 = vsub.f32 %v460_v1, %v468_v20 }
  0x8a   :  { %v87_v25 = vpop.xlane.xlu0 %86  ;;  %v85_v26 = vpop.xlane.xlu1 %84 }
  0x8b   :  { %v89_v28 = vmul.f32 0.03125, %v87_v25  ;;  %v88_v29 = vmul.f32 0.03125, %v85_v26 }
  0x8d   :  { %v93_v32 = vsub.f32 %v89_v28, %v91_v27  ;;  %v92_v33 = vsub.f32 %v88_v29, %v90_v24 }
  0x8f   :  { %v95_v35 = vmax.f32 %v93_v32, 0.0  ;;  %v94_v36 = vmax.f32 %v92_v33, 0.0 }
  0x91   :  { %v99_v38 = vadd.f32 1e-05, %v95_v35  ;;  %v98_v39 = vadd.f32 1e-05, %v94_v36 }
  0x93   :  { %288 = vrsqrt.f32 %v99_v38  ;;  %vm106_vm1 = vweird.f32 %v98_v39  ;;  %vm116_vm3 = vweird.f32 %v99_v38 }
  0x94   :  { %290 = vrsqrt.f32 %v98_v39 }
  0x99   :  { %v289_v44 = vpop.eup %288 }
  0x9a   :  { %v291_v45 = vpop.eup %290  ;;  %v111_v46 = vmul.f32 %v289_v44, %v99_v38  ;;  %vm117_vm0 = vweird.f32 %v289_v44 }
  0x9b   :  { %v101_v48 = vmul.f32 %v291_v45, %v98_v39  ;;  %vm107_vm2 = vweird.f32 %v291_v45  ;;  %vm118_vm4 = vmor %vm116_vm3, %vm117_vm0 }
  0x9c   :  { %v112_v49 = vmul.f32 %v289_v44, %v111_v46  ;;  %vm108_vm5 = vmor %vm106_vm1, %vm107_vm2 }
  0x9d   :  { %v102_v51 = vmul.f32 %v291_v45, %v101_v48 }
  0x9e   :  { %v113_v52 = vmul.f32 0.5, %v112_v49 }
  0x9f   :  { %v103_v54 = vmul.f32 0.5, %v102_v51 }
  0xa0   :  { %v114_v55 = vsub.f32 1.5, %v113_v52 }
  0xa1   :  { %v104_v57 = vsub.f32 1.5, %v103_v54 }
  0xa2   :  { %v115_v58 = vmul.f32 %v289_v44, %v114_v55 }
  0xa3   :  { %v105_v61 = vmul.f32 %v291_v45, %v104_v57 }
  0xa4   :  { %v119_v2 = vsel %vm118_vm4, %v289_v44, %v115_v58 }
  0xa5   :  { %v109_v3 = vsel %vm108_vm5, %v291_v45, %v105_v61  ;;  %v121_v5 = vmul.f32 %v119_v2, %v97_v60 }
  0xa6   :  { %v120_v6 = vmul.f32 %v109_v3, %v96_v63 }
  0xa7   :  { %v127_v7 = vmul.f32 %v284_v62, %v121_v5 }
  0xa8   :  { %v126_v8 = vmul.f32 %v284_v62, %v120_v6 }
  0xa9   :  { %v133_v9 = vadd.f32 %v285_v4, %v127_v7 }
  0xaa   :  { %v132_v10 = vadd.f32 %v285_v4, %v126_v8 }
  0xab   :  { %173 = vmatmul.f32.vlgmr.msra.gmra.mxu2 %v133_v9 }
  0xac   :  { %170 = vmatmul.f32.vlgmr.msra.gmra.mxu0 %v132_v10 }
 0x129   :  { %v171_v15 = vpop.f32.mrf.mxu0 }
 0x12a   :  { %v172_v16 = vadd.f32 %v286_v14, %v171_v15 }
 0x12c   :  { %v177_v17 = vmax.f32 %v172_v16, 0.0 }
 0x12e   :  { %215 = vmatmul.f32.vlgmr.msra.gmra.mxu1 %v177_v17  ;;  %v174_v18 = vpop.f32.mrf.mxu2 }
 0x12f   :  { %v175_v19 = vadd.f32 %v286_v14, %v174_v18 }
 0x131   :  { %v178_v20 = vmax.f32 %v175_v19, 0.0 }
 0x133   :  { %218 = vmatmul.f32.vlgmr.msra.gmra.mxu3 %v178_v20 }
 0x1ab   :  { %v216_v22 = vpop.f32.mrf.mxu1 }
 0x1ac   :  { %v217_v23 = vadd.f32 %v287_v21, %v216_v22 }
 0x1ae   :  { %v222_v24 = vadd.f32 %v217_v23, %v460_v1 }
 0x1b0   :  { %224 = vst [vmem:[#allocation8] sm:$0xff] %v222_v24 }
 0x1b6   :  { %v219_v25 = vpop.f32.mrf.mxu3 }
 0x1b7   :  { %v220_v26 = vadd.f32 %v287_v21, %v219_v25 }
 0x1b9   :  { %v223_v27 = vadd.f32 %v220_v26, %v458_v0 }
 0x1bb   :  { %225 = vst [vmem:[#allocation8 + $0x8] sm:$0xff] %v223_v27 }
 0x1bc   :  { %238 = dma.vmem_to_hbm [thread:$0]  %s231_s2, 256, %s233_s24, [#allocation4], %s395_s9, %s395_s9, %s396_s10  }
 0x1bd   :  { %392 = dma.done.wait [#allocation4], 256  }
 0x1be   :  { %393 = vsyncadd [#allocation4], 4294967040 }
 0x1bf   :  { %243 = vsyncpa [#allocation3], 1 }
 0x1c0   :  { %244 = vsyncpa [#allocation6], 1 }
 0x1c1   :  { %245 = vsyncpa [#allocation4], 1 }

</bundles_post_ra>
